<compile_context>
chip_gen: v6e
topology: v6e:2x2x1
jax: 0.10.0
libtpu: 0.0.40
codegen_flags: <defaults>
</compile_context>

<pallas_src>
import numpy as np
import jax
import jax.numpy as jnp
from jax.experimental import pallas as pl
from jax.experimental.pallas import tpu as pltpu


# ----------------------------- per-block transform -----------------------------
def _block_transform(idx):
    """Transform of a (bpb, t, t) block; plane axes are (1, 2)."""
    if idx == 0:
        return lambda b: jnp.flip(b, axis=(1, 2))
    if idx == 1:
        return lambda b: jnp.flip(jnp.swapaxes(b, 1, 2), axis=1)
    if idx == 2:
        return lambda b: jnp.flip(b, axis=1)
    return lambda b: jnp.swapaxes(b, 1, 2)


def _tile_index_maps(idx, n_tiles):
    """Input/output block index maps for grid (plane_block, h_tile, w_tile).

    The tile-level permutation mirrors the within-tile one, so composing the
    output index_map with the in-kernel block transform reproduces the full
    plane permutation exactly."""
    in_map = lambda p, i, j: (p, i, j)
    if idx == 0:
        out_map = lambda p, i, j: (p, n_tiles - 1 - i, n_tiles - 1 - j)
    elif idx == 1:
        out_map = lambda p, i, j: (p, n_tiles - 1 - j, i)
    elif idx == 2:
        out_map = lambda p, i, j: (p, n_tiles - 1 - i, j)
    else:
        out_map = lambda p, i, j: (p, j, i)
    return in_map, out_map


def _make_kernel(idx, n_arrays):
    tr = _block_transform(idx)

    def kernel(*refs):
        in_refs, out_refs = refs[:n_arrays], refs[n_arrays:]
        for i_ref, o_ref in zip(in_refs, out_refs):
            # Whole-block op: one vld/rev-or-xpose/vst stream per fused array.
            o_ref[...] = tr(i_ref[...]).astype(o_ref.dtype)

    return kernel


# ----------------------------- block / grid sizing -----------------------------
def _physical_vmem_bytes():
    try:
        info = pltpu.get_tpu_info()
        for attr in ("vmem_capacity_bytes", "vmem_size_bytes", "vmem_bytes"):
            v = getattr(info, attr, None)
            if v:
                return int(v)
    except Exception:
        pass
    return 64 << 20  # conservative floor: v7x per-TensorCore VMEM


def _choose_tile(h, itemsize, per_array_cap):
    """Square intra-plane tile: whole plane if it fits, else the largest
    multiple-of-128 divisor of h that fits the per-array block-byte cap."""
    if h * h * itemsize <= per_array_cap:
        return h
    for m in range(h // 128, 0, -1):
        t = m * 128
        if h % t == 0 and t * t * itemsize <= per_array_cap:
            return t
    for m in range(1, h // 128 + 1):
        t = m * 128
        if h % t == 0:
            return t
    # TODO(synk): ragged intra-plane tiling for huge H not divisible by 128.
    return h


def _choose_planes_per_block(n_planes, tiles_per_plane, tile_bytes, per_array_cap):
    """Planes per block: fill the byte cap, but keep total grid >= 4 steps so
    v7x's two TensorCores each get pipelined (>= 2-step) work."""
    cap = max(1, per_array_cap // max(tile_bytes, 1))
    bpb = max(1, min(cap, n_planes))
    target = min(4, n_planes * tiles_per_plane)
    while bpb > 1 and pl.cdiv(n_planes, bpb) * tiles_per_plane < target:
        bpb -= 1
    return bpb


# ----------------------------------- wrapper -----------------------------------
def _apply_attack(arrays, idx, max_block_bytes=None, donate=False):
    """Apply the idx-specialized permutation to same-shaped (N, C, H, W) arrays
    with a single fused pallas_call."""
    n, c, h, w = arrays[0].shape
    assert h == w, "rotate(expand=False) is a pure permutation only for square images"
    # TODO(synk): non-square images under torchvision rotate(expand=False) crop/pad.

    n_arrays = len(arrays)
    itemsize = arrays[0].dtype.itemsize
    n_planes = n * c

    physical = _physical_vmem_bytes()
    budget = int(physical * 0.7)                       # headroom for internal scratch
    # 2x double-buffer * (in + out) per fused array, plus transpose temporaries.
    per_array_cap = max(64 << 10, min(8 << 20, budget // (6 * n_arrays)))
    if max_block_bytes is not None:
        per_array_cap = min(per_array_cap, int(max_block_bytes))

    t = _choose_tile(h, itemsize, per_array_cap)
    n_tiles = h // t
    tile_bytes = t * t * itemsize
    bpb = _choose_planes_per_block(n_planes, n_tiles * n_tiles, tile_bytes, per_array_cap)
    grid = (pl.cdiv(n_planes, bpb), n_tiles, n_tiles)

    block_bytes = bpb * tile_bytes
    vmem_limit = int(min(budget, max(32 << 20, 6 * n_arrays * block_bytes + (8 << 20))))

    in_map, out_map = _tile_index_maps(idx, n_tiles)
    in_spec = pl.BlockSpec((bpb, t, t), in_map)
    out_spec = pl.BlockSpec((bpb, t, t), out_map)

    flat = [a.reshape(n_planes, h, w) for a in arrays]

    # In-place is only safe when the block maps are identity (whole-plane tiles).
    io_aliases = {i: i for i in range(n_arrays)} if (donate and n_tiles == 1) else {}

    outs = pl.pallas_call(
        _make_kernel(idx, n_arrays),
        out_shape=tuple(jax.ShapeDtypeStruct((n_planes, h, w), a.dtype) for a in arrays),
        grid=grid,
        in_specs=[in_spec] * n_arrays,
        out_specs=tuple([out_spec] * n_arrays),
        input_output_aliases=io_aliases,
        compiler_params=pltpu.CompilerParams(
            dimension_semantics=("parallel", "parallel", "parallel"),
            vmem_limit_bytes=vmem_limit),
    )(*flat)
    if not isinstance(outs, (tuple, list)):
        outs = (outs,)
    return tuple(o.reshape(n, c, h, w) for o in outs)


def attack_transform(stego, secret, idx, *, max_block_bytes=None, donate=False):
    """JAX/Pallas equivalent of AttackTransform.forward for a fixed idx.

    idx mirrors random.randint(0, 3) in the PyTorch module (host-side), so the
    kernel is specialized per idx (at most 4 cached compilations)."""
    idx = int(idx) % 4
    if stego.shape == secret.shape and stego.dtype == secret.dtype:
        return _apply_attack((stego, secret), idx, max_block_bytes, donate)
    (out_s,) = _apply_attack((stego,), idx, max_block_bytes, donate)
    (out_t,) = _apply_attack((secret,), idx, max_block_bytes, donate)
    return out_s, out_t


# ---------------------------------- reference ----------------------------------
def _reference(x, idx):
    """Pure-JAX reference: flips first (as in the module), then CCW rotation."""
    if idx % 2 == 0:                                   # flip_h
        x = jnp.flip(x, axis=-1)
    if idx % 3 == 0:                                   # flip_v
        x = jnp.flip(x, axis=-2)
    return jnp.rot90(x, k=idx, axes=(-2, -1))          # CCW, expand=False


if __name__ == "__main__":
    key = jax.random.PRNGKey(0)
    k_s, k_t, k_i = jax.random.split(key, 3)

    N, C, H, W = 2, 4, 128, 128
    stego = jax.random.normal(k_s, (N, C, H, W), dtype=jnp.float32)
    secret = jax.random.normal(k_t, (N, C, H, W), dtype=jnp.float32)

    # Deterministic stand-in for python's random.randint(0, 3).
    rand_idx = int(jax.random.randint(k_i, (), 0, 4))

    # Exercise every specialized branch; the randomly drawn one first.
    for idx in [rand_idx] + [i for i in range(4) if i != rand_idx]:
        out_stego, out_secret = attack_transform(stego, secret, idx)
        jax.block_until_ready((out_stego, out_secret))
        np.testing.assert_array_equal(np.asarray(out_stego),
                                      np.asarray(_reference(stego, idx)))
        np.testing.assert_array_equal(np.asarray(out_secret),
                                      np.asarray(_reference(secret, idx)))

    # Also exercise the intra-plane tiling path (force a small block cap so the
    # 256x256 plane is split into 128x128 tiles and the tile-level index maps run).
    stego2 = jax.random.normal(k_s, (1, 2, 256, 256), dtype=jnp.float32)
    secret2 = jax.random.normal(k_t, (1, 2, 256, 256), dtype=jnp.float32)
    for idx in range(4):
        out_s2, out_t2 = attack_transform(stego2, secret2, idx,
                                          max_block_bytes=128 << 10)
        jax.block_until_ready((out_s2, out_t2))
        np.testing.assert_array_equal(np.asarray(out_s2),
                                      np.asarray(_reference(stego2, idx)))
        np.testing.assert_array_equal(np.asarray(out_t2),
                                      np.asarray(_reference(secret2, idx)))

    print("KERNEL_OK")
</pallas_src>

<mosaic_0001>
module attributes {stable_mosaic.version = 11 : i64} {
  func.func @kernel(%arg0: i32, %arg1: i32, %arg2: i32, %arg3: memref<2x128x128xf32, #tpu.memory_space<vmem>>, %arg4: memref<2x128x128xf32, #tpu.memory_space<vmem>>, %arg5: memref<2x128x128xf32, #tpu.memory_space<vmem>>, %arg6: memref<2x128x128xf32, #tpu.memory_space<vmem>>) attributes {dimension_semantics = [#tpu.dimension_semantics<parallel>, #tpu.dimension_semantics<parallel>, #tpu.dimension_semantics<parallel>], iteration_bounds = array<i64: 4, 1, 1>, scalar_prefetch = 0 : i64, scratch_operands = 0 : i64, tpu.core_type = #tpu.core_type<tc>, window_params = [{transform_indices = @transform_0, window_bounds = array<i64: 2, 128, 128>}, {transform_indices = @transform_1, window_bounds = array<i64: 2, 128, 128>}, {transform_indices = @transform_2, window_bounds = array<i64: 2, 128, 128>}, {transform_indices = @transform_3, window_bounds = array<i64: 2, 128, 128>}]} {
    %c0 = arith.constant 0 : index
    %c0_0 = arith.constant 0 : index
    %c0_1 = arith.constant 0 : index
    %0 = vector.load %arg3[%c0, %c0_0, %c0_1] : memref<2x128x128xf32, #tpu.memory_space<vmem>>, vector<2x128x128xf32>
    %1 = tpu.transpose %0, [0, 2, 1] : vector<2x128x128xf32> -> vector<2x128x128xf32>
    %c0_2 = arith.constant 0 : index
    %c0_3 = arith.constant 0 : index
    %c0_4 = arith.constant 0 : index
    %2 = vector.load %arg5[%c0_2, %c0_3, %c0_4] : memref<2x128x128xf32, #tpu.memory_space<vmem>>, vector<2x128x128xf32>
    tpu.vector_store %arg5[%c0_2, %c0_3, %c0_4], %1 {strides = array<i32>} : memref<2x128x128xf32, #tpu.memory_space<vmem>>, vector<2x128x128xf32>,
    %c0_5 = arith.constant 0 : index
    %c0_6 = arith.constant 0 : index
    %c0_7 = arith.constant 0 : index
    %3 = vector.load %arg4[%c0_5, %c0_6, %c0_7] : memref<2x128x128xf32, #tpu.memory_space<vmem>>, vector<2x128x128xf32>
    %4 = tpu.transpose %3, [0, 2, 1] : vector<2x128x128xf32> -> vector<2x128x128xf32>
    %c0_8 = arith.constant 0 : index
    %c0_9 = arith.constant 0 : index
    %c0_10 = arith.constant 0 : index
    %5 = vector.load %arg6[%c0_8, %c0_9, %c0_10] : memref<2x128x128xf32, #tpu.memory_space<vmem>>, vector<2x128x128xf32>
    tpu.vector_store %arg6[%c0_8, %c0_9, %c0_10], %4 {strides = array<i32>} : memref<2x128x128xf32, #tpu.memory_space<vmem>>, vector<2x128x128xf32>,
    return
  }
  func.func @transform_0(%arg0: i32, %arg1: i32, %arg2: i32) -> (i32, i32, i32) {
    %c0_i32 = arith.constant 0 : i32
    return %arg0, %arg1, %arg2 : i32, i32, i32
  }
  func.func @transform_1(%arg0: i32, %arg1: i32, %arg2: i32) -> (i32, i32, i32) {
    %c0_i32 = arith.constant 0 : i32
    return %arg0, %arg1, %arg2 : i32, i32, i32
  }
  func.func @transform_2(%arg0: i32, %arg1: i32, %arg2: i32) -> (i32, i32, i32) {
    %c0_i32 = arith.constant 0 : i32
    return %arg0, %arg2, %arg1 : i32, i32, i32
  }
  func.func @transform_3(%arg0: i32, %arg1: i32, %arg2: i32) -> (i32, i32, i32) {
    %c0_i32 = arith.constant 0 : i32
    return %arg0, %arg2, %arg1 : i32, i32, i32
  }
}

</mosaic_0001>

<bundles_post_ra>
// kernel: tpu_custom_call.1
= control target key start
LH: loop header
LB: loop body
LE: loop exit
PB: predicated region body
PF: predicated region fallthrough
CT: control target
= control target key end

     0   :  { %s1417_s0 = inlined_call_operand.hbm [shape: f32[8,128,128], index: 0, kind: input, shape index: {}]   ;;  %s1418_s1 = inlined_call_operand.hbm [shape: f32[8,128,128], index: 1, kind: input, shape index: {}]   ;;  %s1419_s2 = inlined_call_operand.hbm [shape: f32[8,128,128], index: 2, kind: output, shape index: {0}]   ;;  %s1420_s3 = inlined_call_operand.hbm [shape: f32[8,128,128], index: 3, kind: output, shape index: {1}]  }
   0x1   :  { %1421 = sst [smem:[#allocation14_spill]] %s1417_s0 }
   0x2   :  { %9 = vsyncpa [#allocation3], 0 }
   0x3   :  { %11 = vsyncpa [#allocation3 + $0x1], 0 }
   0x4   :  { %12 = vsyncpa [#allocation6], 0 }
   0x5   :  { %14 = vsyncpa [#allocation6 + $0x1], 0 }
   0x6   :  { %15 = vsyncpa [#allocation4], 0 }
   0x7   :  { %17 = vsyncpa [#allocation4 + $0x1], 0 }
   0x8   :  { %18 = vsyncpa [#allocation9], 0 }
   0x9   :  { %20 = vsyncpa [#allocation9 + $0x1], 0  ;;  %s1056_s12 = smov 0   ;;  %s1058_s13 = smov 0  }
   0xa   :  { %s1060_s14 = smov 0   ;;  %s1062_s15 = smov 0  }
   0xb   :  { %s1064_s16 = smov 0   ;;  %s1066_s17 = smov 0  }
   0xc LB: > { %s745_s18 = sadd.s32 4294967295, %s1026_s17   ;;  %s746_s19 = sadd.s32 4294967294, %s1026_s17   ;;  %s1026_s17 = sphi %s1066_s17, %s26_s17   ;;  %s1022_s16 = sphi %s1064_s16, %s1433_s16   ;;  %s1018_s15 = sphi %s1062_s15, %s1432_s15   ;;  %s1014_s14 = sphi %s1060_s14, %s1431_s14   ;;  %s1010_s13 = sphi %s1058_s13, %s1430_s13   ;;  %s1006_s12 = sphi %s1056_s12, %s1429_s12  }
   0xd   : > { %s45_s20 = sadd.s32 1, %s1022_s16  ;;  %s56_s21 = sadd.s32 1, %s1014_s14 }
   0xe   : > { %p47_p0 = scmp.ge.s32.totalorder %s45_s20, 4  ;;  %p63_p1 = scmp.ne.s32.totalorder %s1014_s14, %s1010_s13 }
   0xf   : > { %p64_p2 = scmp.eq.s32.totalorder %s1026_s17, 0  ;;  %p69_p3 = scmp.ne.s32.totalorder %s1010_s13, %s1006_s12 }
  0x10   : > { %s1435_s20 = smov (%p47_p0, %s45_s20), 0  ;;  %p70_p5 = scmp.eq.s32.totalorder %s745_s18, 0 }
  0x11   : > { %p1097_p4 = por %p64_p2, %p63_p1  ;;  %s49_s23 = ssub.s32 %s1022_s16, %s1435_s20 }
  0x12   : > { %p127_p6 = scmp.eq.s32.totalorder %s745_s18, 3  ;;  %p54_p7 = scmp.eq.s32.totalorder %s49_s23, 0 }
  0x13   : > { %p1103_p8 = por %p70_p5, %p69_p3  ;;  %p133_p10 = scmp.eq.s32.totalorder %s746_s19, 3 }
  0x14   : > { %p1107_p9 = por %p127_p6, %p63_p1  ;;  %p802_p12 = scmp.lt.s32.totalorder %s1026_s17, 4 }
  0x15   : > { %s1112_s26 = scalar_select %p54_p7, %s1014_s14, %s56_s21  }
  0x16   : > { %p1114_p11 = por %p133_p10, %p69_p3  ;;  %s1120_s28 = sand.u32 1, %s1014_s14  }
  0x17   : > { %s749_s29 = sshll.u32 %s1120_s28, 8  ;;  %s773_s30 = sshll.u32 %s1022_s16, 12 }
  0x18   : > { %s1426_s0 = sld [smem:[#allocation14_spill]]  ;;  %s187_s7 = scalar_lea.vmem [#allocation2], %s749_s29 }
  0x19   : > { %s198_s8 = sshll.u32 %s187_s7, 4  ;;  %p1133_p13 = pnand %p802_p12, %p1097_p4  ;;  %s199_s8 = int_to_ptr.vmem [resolvable:$true] %s198_s8 }
  0x1a   : > { %p757_p0 = scmp.ge.s32.totalorder %s1026_s17, 1  ;;  %s184_s10 = scalar_lea.sflag [#allocation3], %s1120_s28 }
  0x1b   : > { %p858_p1 = pneg %p1133_p13  ;;  %s869_s11 = scalar_lea.vmem %s199_s8, 4096 }
  0x1c   : > { %p870_p2 = scmp.ne.s32.totalorder %s199_s8, %s869_s11  ;;  %s1028_s18 = smov [#allocation2]  }
  0x1d   : > { %s874_s19 = sshll.u32 %s1028_s18, 4  ;;  %s875_s19 = int_to_ptr.vmem [resolvable:$false] %s874_s19 }
  0x1e   : > { %s197_s6 = scalar_lea.hbm %s1426_s0, %s773_s30  ;;  %p872_p3 = pnand %p870_p2, %p858_p1 }
  0x1f   : > { %s876_s21 = scalar_lea.vmem %s875_s19, 8192  ;;  %p877_p4 = scmp.lt.s32.totalorder %s199_s8, %s875_s19 }
  0x20   : > { %p873_p5 = pneg %p872_p3  ;;  %p878_p6 = scmp.lt.s32.totalorder %s876_s21, %s869_s11 }
  0x22   : > { %p879_p7 = por %p878_p6, %p877_p4 }
  0x24   : > { %p880_p10 = pnand %p879_p7, %p873_p5 }
  0x26   : > { %883 = shalt.err (!%p880_p10)
}
  0x27   : > { %s1029_s22 = smov 128   ;;  %s1030_s23 = smov 8  }
  0x28   : > { %791 = dma.hbm_to_vmem [thread:$0]  (!%p1133_p13), %s197_s6, 4096, %s199_s8, %s184_s10, %s1029_s22, %s1029_s22, %s1030_s23  }
  0x29   : > { %p231_p12 = scmp.lt.s32.totalorder %s1026_s17, 5  ;;  %s222_s7 = scalar_lea.hbm %s1418_s1, %s773_s30 }
  0x2a   : > { %s212_s18 = scalar_lea.vmem [#allocation5], %s749_s29  ;;  %s209_s21 = scalar_lea.sflag [#allocation6], %s1120_s28 }
  0x2b   : > { %p1154_p2 = pnand %p757_p0, %p231_p12  ;;  %s223_s19 = sshll.u32 %s212_s18, 4  ;;  %s224_s19 = int_to_ptr.vmem [resolvable:$true] %s223_s19 }
  0x2c   : > { %s897_s0 = scalar_lea.vmem %s224_s19, 4096  ;;  %s1031_s6 = smov [#allocation5]  }
  0x2d   : > { %p898_p3 = scmp.ne.s32.totalorder %s224_s19, %s897_s0  ;;  %s902_s8 = sshll.u32 %s1031_s6, 4  ;;  %s903_s8 = int_to_ptr.vmem [resolvable:$false] %s902_s8 }
  0x2e   : > { %s904_s30 = scalar_lea.vmem %s903_s8, 8192  ;;  %p905_p6 = scmp.lt.s32.totalorder %s224_s19, %s903_s8 }
  0x2f   : > { %p900_p5 = pnand %p898_p3, %p858_p1  ;;  %p906_p0 = scmp.lt.s32.totalorder %s904_s30, %s897_s0 }
  0x31   : > { %p901_p4 = pneg %p900_p5  ;;  %p907_p7 = por %p906_p0, %p905_p6 }
  0x33   : > { %p908_p10 = pnand %p907_p7, %p901_p4 }
  0x35   : > { %911 = shalt.err (!%p908_p10)
}
  0x36   : > { %794 = dma.hbm_to_vmem [thread:$0]  (!%p1133_p13), %s222_s7, 4096, %s224_s19, %s209_s21, %s1029_s22, %s1029_s22, %s1030_s23  }
  0x37   : > { %235 = sbr.rel (%p1154_p2) target bundleno = 336 (0x150), region = 28  ;;  %s1169_s28 = sand.u32 (!%p1154_p2), 1, %s1010_s13  }
  0x38   : > { %s1172_s29 = sshll.u32 (!%p1154_p2), %s1169_s28, 8  ;;  %s238_s10 = scalar_lea.sflag (!%p1154_p2), [#allocation3], %s1169_s28 }
  0x39   : > { %s1176_s0 = scalar_lea.vmem (!%p1154_p2), [#allocation2], %s1172_s29 }
  0x3c   : > { %989 = dma.done.wait (%p1103_p8), %s238_s10, 4096  }
  0x3d   : > { %991 = vsyncadd (%p1103_p8), %s238_s10, 4294963200  ;;  %s247_s9 = scalar_lea.sflag [#allocation6], %s1169_s28  ;;  %s1184_s22 = scalar_lea.vmem [#allocation5], %s1172_s29 }
  0x3e   : > { %993 = dma.done.wait (%p1103_p8), %s247_s9, 4096  }
  0x3f   : > { %995 = vsyncadd (%p1103_p8), %s247_s9, 4294963200  ;;  %v307_v0 = vld [vmem:[%s1176_s0 + $0x80] sm:$0xff]  ;;  %v308_v2 = vld [vmem:[%s1176_s0 + $0x88] sm:$0xff]  ;;  %s1255_s24 = scalar_lea.vmem [#allocation7], %s1172_s29  ;;  %s777_s23 = sshll.u32 %s1018_s15, 12 }
  0x40   : > { %v291_v1 = vld [vmem:[%s1176_s0] sm:$0xff]  ;;  %355 = vxpose.xlu1.b32.start [1/16] %v307_v0, 128  ;;  %v292_v3 = vld [vmem:[%s1176_s0 + $0x8] sm:$0xff]  ;;  %v309_v4 = vld [vmem:[%s1176_s0 + $0x90] sm:$0xff]  ;;  %s570_s4 = sshll.u32 %s1255_s24, 4  ;;  %s1294_s11 = scalar_lea.hbm %s1419_s2, %s777_s23  ;;  %s1296_s4 = int_to_ptr.vmem [resolvable:$true] %s570_s4 }
  0x41   : > { %323 = vxpose.xlu0.b32.start [1/16] %v291_v1, 128  ;;  %v293_v5 = vld [vmem:[%s1176_s0 + $0x10] sm:$0xff]  ;;  %v310_v6 = vld [vmem:[%s1176_s0 + $0x98] sm:$0xff]  ;;  %v311_v8 = vld [vmem:[%s1176_s0 + $0xa0] sm:$0xff]  ;;  %s548_s18 = scalar_lea.sflag [#allocation4], %s1169_s28  ;;  %s912_s19 = scalar_lea.vmem %s1296_s4, 4096 }
  0x42   : > { %v294_v7 = vld [vmem:[%s1176_s0 + $0x18] sm:$0xff]  ;;  %v295_v9 = vld [vmem:[%s1176_s0 + $0x20] sm:$0xff]  ;;  %v312_v10 = vld [vmem:[%s1176_s0 + $0xa8] sm:$0xff]  ;;  %p913_p8 = scmp.ne.s32.totalorder %s1296_s4, %s912_s19  ;;  %s1032_s21 = smov [#allocation7]  }
  0x43   : > { %v296_v11 = vld [vmem:[%s1176_s0 + $0x28] sm:$0xff]  ;;  %v313_v12 = vld [vmem:[%s1176_s0 + $0xb0] sm:$0xff]  ;;  %v314_v14 = vld [vmem:[%s1176_s0 + $0xb8] sm:$0xff]  ;;  %s916_s6 = sshll.u32 %s1032_s21, 4  ;;  %s917_s6 = int_to_ptr.vmem [resolvable:$false] %s916_s6 }
  0x44   : > { %356 = vxpose.xlu1.b32.cont [2/16] %v308_v2, 128  ;;  %v297_v13 = vld [vmem:[%s1176_s0 + $0x30] sm:$0xff]  ;;  %v298_v15 = vld [vmem:[%s1176_s0 + $0x38] sm:$0xff]  ;;  %v315_v16 = vld [vmem:[%s1176_s0 + $0xc0] sm:$0xff]  ;;  %p914_p13 = pnand %p913_p8, %p1107_p9  ;;  %s918_s8 = scalar_lea.vmem %s917_s6, 8192 }
  0x45   : > { %324 = vxpose.xlu0.b32.cont [2/16] %v292_v3, 128  ;;  %v299_v17 = vld [vmem:[%s1176_s0 + $0x40] sm:$0xff]  ;;  %v316_v18 = vld [vmem:[%s1176_s0 + $0xc8] sm:$0xff]  ;;  %v317_v20 = vld [vmem:[%s1176_s0 + $0xd0] sm:$0xff]  ;;  %p919_p12 = scmp.lt.s32.totalorder %s1296_s4, %s917_s6  ;;  %p920_p2 = scmp.lt.s32.totalorder %s918_s8, %s912_s19 }
  0x46   : > { %v300_v19 = vld [vmem:[%s1176_s0 + $0x48] sm:$0xff]  ;;  %v301_v21 = vld [vmem:[%s1176_s0 + $0x50] sm:$0xff]  ;;  %v318_v22 = vld [vmem:[%s1176_s0 + $0xd8] sm:$0xff]  ;;  %p915_p1 = pneg %p914_p13 }
  0x47   : > { %v302_v23 = vld [vmem:[%s1176_s0 + $0x58] sm:$0xff]  ;;  %v319_v24 = vld [vmem:[%s1176_s0 + $0xe0] sm:$0xff]  ;;  %v320_v26 = vld [vmem:[%s1176_s0 + $0xe8] sm:$0xff]  ;;  %p921_p3 = por %p920_p2, %p919_p12 }
  0x48   : > { %357 = vxpose.xlu1.b32.cont [3/16] %v309_v4, 128  ;;  %v303_v25 = vld [vmem:[%s1176_s0 + $0x60] sm:$0xff]  ;;  %v304_v27 = vld [vmem:[%s1176_s0 + $0x68] sm:$0xff]  ;;  %v321_v28 = vld [vmem:[%s1176_s0 + $0xf0] sm:$0xff] }
  0x49   : > { %325 = vxpose.xlu0.b32.cont [3/16] %v293_v5, 128  ;;  %v305_v29 = vld [vmem:[%s1176_s0 + $0x70] sm:$0xff]  ;;  %v322_v30 = vld [vmem:[%s1176_s0 + $0xf8] sm:$0xff]  ;;  %v435_v32 = vld [vmem:[%s1184_s22 + $0x80] sm:$0xff]  ;;  %p922_p5 = pnand %p921_p3, %p915_p1 }
  0x4a   : > { %v306_v31 = vld [vmem:[%s1176_s0 + $0x78] sm:$0xff]  ;;  %v419_v33 = vld [vmem:[%s1184_s22] sm:$0xff]  ;;  %v436_v34 = vld [vmem:[%s1184_s22 + $0x88] sm:$0xff] }
  0x4b   : > { %v420_v35 = vld [vmem:[%s1184_s22 + $0x8] sm:$0xff]  ;;  %v437_v36 = vld [vmem:[%s1184_s22 + $0x90] sm:$0xff]  ;;  %v438_v38 = vld [vmem:[%s1184_s22 + $0x98] sm:$0xff] }
  0x4c   : > { %358 = vxpose.xlu1.b32.cont [4/16] %v310_v6, 128  ;;  %v421_v37 = vld [vmem:[%s1184_s22 + $0x10] sm:$0xff]  ;;  %v422_v39 = vld [vmem:[%s1184_s22 + $0x18] sm:$0xff]  ;;  %v439_v40 = vld [vmem:[%s1184_s22 + $0xa0] sm:$0xff] }
  0x4d   : > { %326 = vxpose.xlu0.b32.cont [4/16] %v294_v7, 128  ;;  %v423_v41 = vld [vmem:[%s1184_s22 + $0x20] sm:$0xff]  ;;  %v440_v42 = vld [vmem:[%s1184_s22 + $0xa8] sm:$0xff]  ;;  %v441_v44 = vld [vmem:[%s1184_s22 + $0xb0] sm:$0xff] }
  0x4e   : > { %v424_v43 = vld [vmem:[%s1184_s22 + $0x28] sm:$0xff]  ;;  %v425_v45 = vld [vmem:[%s1184_s22 + $0x30] sm:$0xff]  ;;  %v442_v46 = vld [vmem:[%s1184_s22 + $0xb8] sm:$0xff] }
  0x4f   : > { %v426_v47 = vld [vmem:[%s1184_s22 + $0x38] sm:$0xff]  ;;  %v443_v48 = vld [vmem:[%s1184_s22 + $0xc0] sm:$0xff]  ;;  %v444_v50 = vld [vmem:[%s1184_s22 + $0xc8] sm:$0xff] }
  0x50   : > { %359 = vxpose.xlu1.b32.cont [5/16] %v311_v8, 128  ;;  %v427_v49 = vld [vmem:[%s1184_s22 + $0x40] sm:$0xff]  ;;  %v428_v51 = vld [vmem:[%s1184_s22 + $0x48] sm:$0xff]  ;;  %v445_v52 = vld [vmem:[%s1184_s22 + $0xd0] sm:$0xff] }
  0x51   : > { %327 = vxpose.xlu0.b32.cont [5/16] %v295_v9, 128  ;;  %v429_v53 = vld [vmem:[%s1184_s22 + $0x50] sm:$0xff]  ;;  %v446_v54 = vld [vmem:[%s1184_s22 + $0xd8] sm:$0xff]  ;;  %v447_v56 = vld [vmem:[%s1184_s22 + $0xe0] sm:$0xff] }
  0x52   : > { %v430_v55 = vld [vmem:[%s1184_s22 + $0x58] sm:$0xff]  ;;  %v431_v57 = vld [vmem:[%s1184_s22 + $0x60] sm:$0xff]  ;;  %v448_v58 = vld [vmem:[%s1184_s22 + $0xe8] sm:$0xff] }
  0x53   : > { %v432_v59 = vld [vmem:[%s1184_s22 + $0x68] sm:$0xff]  ;;  %v449_v60 = vld [vmem:[%s1184_s22 + $0xf0] sm:$0xff]  ;;  %v450_v62 = vld [vmem:[%s1184_s22 + $0xf8] sm:$0xff] }
  0x54   : > { %360 = vxpose.xlu1.b32.cont [6/16] %v312_v10, 128  ;;  %v433_v61 = vld [vmem:[%s1184_s22 + $0x70] sm:$0xff]  ;;  %v434_v63 = vld [vmem:[%s1184_s22 + $0x78] sm:$0xff] }
  0x55   : > { %328 = vxpose.xlu0.b32.cont [6/16] %v296_v11, 128 }
  0x58   : > { %361 = vxpose.xlu1.b32.cont [7/16] %v313_v12, 128 }
  0x59   : > { %329 = vxpose.xlu0.b32.cont [7/16] %v297_v13, 128 }
  0x5c   : > { %362 = vxpose.xlu1.b32.cont [8/16] %v314_v14, 128 }
  0x5d   : > { %330 = vxpose.xlu0.b32.cont [8/16] %v298_v15, 128 }
  0x60   : > { %363 = vxpose.xlu1.b32.cont [9/16] %v315_v16, 128 }
  0x61   : > { %331 = vxpose.xlu0.b32.cont [9/16] %v299_v17, 128 }
  0x64   : > { %364 = vxpose.xlu1.b32.cont [10/16] %v316_v18, 128 }
  0x65   : > { %332 = vxpose.xlu0.b32.cont [10/16] %v300_v19, 128 }
  0x68   : > { %365 = vxpose.xlu1.b32.cont [11/16] %v317_v20, 128 }
  0x69   : > { %333 = vxpose.xlu0.b32.cont [11/16] %v301_v21, 128 }
  0x6c   : > { %366 = vxpose.xlu1.b32.cont [12/16] %v318_v22, 128 }
  0x6d   : > { %334 = vxpose.xlu0.b32.cont [12/16] %v302_v23, 128 }
  0x70   : > { %367 = vxpose.xlu1.b32.cont [13/16] %v319_v24, 128 }
  0x71   : > { %335 = vxpose.xlu0.b32.cont [13/16] %v303_v25, 128 }
  0x74   : > { %368 = vxpose.xlu1.b32.cont [14/16] %v320_v26, 128 }
  0x75   : > { %336 = vxpose.xlu0.b32.cont [14/16] %v304_v27, 128 }
  0x78   : > { %369 = vxpose.xlu1.b32.cont [15/16] %v321_v28, 128 }
  0x79   : > { %337 = vxpose.xlu0.b32.cont [15/16] %v305_v29, 128 }
  0x7c   : > { %370 = vxpose.xlu1.b32.end [16/16] %v322_v30, 128 }
  0x7d   : > { %338 = vxpose.xlu0.b32.end [16/16] %v306_v31, 128 }
  0x80   : > { %483 = vxpose.xlu1.b32.start [1/16] %v435_v32, 128 }
  0x81   : > { %451 = vxpose.xlu0.b32.start [1/16] %v419_v33, 128 }
  0x84   : > { %484 = vxpose.xlu1.b32.cont [2/16] %v436_v34, 128 }
  0x85   : > { %452 = vxpose.xlu0.b32.cont [2/16] %v420_v35, 128 }
  0x88   : > { %485 = vxpose.xlu1.b32.cont [3/16] %v437_v36, 128 }
  0x89   : > { %453 = vxpose.xlu0.b32.cont [3/16] %v421_v37, 128 }
  0x8c   : > { %486 = vxpose.xlu1.b32.cont [4/16] %v438_v38, 128 }
  0x8d   : > { %454 = vxpose.xlu0.b32.cont [4/16] %v422_v39, 128 }
  0x90   : > { %487 = vxpose.xlu1.b32.cont [5/16] %v439_v40, 128 }
  0x91   : > { %455 = vxpose.xlu0.b32.cont [5/16] %v423_v41, 128 }
  0x94   : > { %488 = vxpose.xlu1.b32.cont [6/16] %v440_v42, 128 }
  0x95   : > { %456 = vxpose.xlu0.b32.cont [6/16] %v424_v43, 128 }
  0x98   : > { %489 = vxpose.xlu1.b32.cont [7/16] %v441_v44, 128 }
  0x99   : > { %457 = vxpose.xlu0.b32.cont [7/16] %v425_v45, 128 }
  0x9c   : > { %490 = vxpose.xlu1.b32.cont [8/16] %v442_v46, 128 }
  0x9d   : > { %458 = vxpose.xlu0.b32.cont [8/16] %v426_v47, 128 }
  0xa0   : > { %491 = vxpose.xlu1.b32.cont [9/16] %v443_v48, 128 }
  0xa1   : > { %459 = vxpose.xlu0.b32.cont [9/16] %v427_v49, 128 }
  0xa4   : > { %492 = vxpose.xlu1.b32.cont [10/16] %v444_v50, 128 }
  0xa5   : > { %460 = vxpose.xlu0.b32.cont [10/16] %v428_v51, 128 }
  0xa8   : > { %493 = vxpose.xlu1.b32.cont [11/16] %v445_v52, 128 }
  0xa9   : > { %461 = vxpose.xlu0.b32.cont [11/16] %v429_v53, 128 }
  0xac   : > { %494 = vxpose.xlu1.b32.cont [12/16] %v446_v54, 128 }
  0xad   : > { %462 = vxpose.xlu0.b32.cont [12/16] %v430_v55, 128 }
  0xb0   : > { %495 = vxpose.xlu1.b32.cont [13/16] %v447_v56, 128 }
  0xb1   : > { %463 = vxpose.xlu0.b32.cont [13/16] %v431_v57, 128 }
  0xb4   : > { %496 = vxpose.xlu1.b32.cont [14/16] %v448_v58, 128 }
  0xb5   : > { %464 = vxpose.xlu0.b32.cont [14/16] %v432_v59, 128 }
  0xb8   : > { %497 = vxpose.xlu1.b32.cont [15/16] %v449_v60, 128 }
  0xb9   : > { %465 = vxpose.xlu0.b32.cont [15/16] %v433_v61, 128 }
  0xbc   : > { %498 = vxpose.xlu1.b32.end [16/16] %v450_v62, 128  ;;  %v371_v0 = vpop.trf.xlu1 }
  0xbd   : > { %466 = vxpose.xlu0.b32.end [16/16] %v434_v63, 128  ;;  %v339_v1 = vpop.trf.xlu0  ;;  %403 = vst [vmem:[%s1255_s24 + $0x80] sm:$0xff] %v371_v0 }
  0xbe   : > { %387 = vst [vmem:[%s1255_s24] sm:$0xff] %v339_v1 }
  0xc0   : > { %v372_v2 = vpop.trf.xlu1 }
  0xc1   : > { %v340_v3 = vpop.trf.xlu0  ;;  %404 = vst [vmem:[%s1255_s24 + $0x88] sm:$0xff] %v372_v2 }
  0xc2   : > { %388 = vst [vmem:[%s1255_s24 + $0x8] sm:$0xff] %v340_v3 }
  0xc4   : > { %v373_v4 = vpop.trf.xlu1 }
  0xc5   : > { %v341_v5 = vpop.trf.xlu0  ;;  %405 = vst [vmem:[%s1255_s24 + $0x90] sm:$0xff] %v373_v4 }
  0xc6   : > { %389 = vst [vmem:[%s1255_s24 + $0x10] sm:$0xff] %v341_v5 }
  0xc8   : > { %v374_v6 = vpop.trf.xlu1 }
  0xc9   : > { %v342_v7 = vpop.trf.xlu0  ;;  %406 = vst [vmem:[%s1255_s24 + $0x98] sm:$0xff] %v374_v6 }
  0xca   : > { %390 = vst [vmem:[%s1255_s24 + $0x18] sm:$0xff] %v342_v7 }
  0xcc   : > { %v375_v8 = vpop.trf.xlu1 }
  0xcd   : > { %v343_v9 = vpop.trf.xlu0  ;;  %407 = vst [vmem:[%s1255_s24 + $0xa0] sm:$0xff] %v375_v8 }
  0xce   : > { %391 = vst [vmem:[%s1255_s24 + $0x20] sm:$0xff] %v343_v9 }
  0xd0   : > { %v376_v10 = vpop.trf.xlu1 }
  0xd1   : > { %v344_v11 = vpop.trf.xlu0  ;;  %408 = vst [vmem:[%s1255_s24 + $0xa8] sm:$0xff] %v376_v10 }
  0xd2   : > { %392 = vst [vmem:[%s1255_s24 + $0x28] sm:$0xff] %v344_v11 }
  0xd4   : > { %v377_v12 = vpop.trf.xlu1 }
  0xd5   : > { %v345_v13 = vpop.trf.xlu0  ;;  %409 = vst [vmem:[%s1255_s24 + $0xb0] sm:$0xff] %v377_v12 }
  0xd6   : > { %393 = vst [vmem:[%s1255_s24 + $0x30] sm:$0xff] %v345_v13 }
  0xd8   : > { %v378_v14 = vpop.trf.xlu1 }
  0xd9   : > { %v346_v15 = vpop.trf.xlu0  ;;  %410 = vst [vmem:[%s1255_s24 + $0xb8] sm:$0xff] %v378_v14 }
  0xda   : > { %394 = vst [vmem:[%s1255_s24 + $0x38] sm:$0xff] %v346_v15 }
  0xdc   : > { %v379_v16 = vpop.trf.xlu1 }
  0xdd   : > { %v347_v17 = vpop.trf.xlu0  ;;  %411 = vst [vmem:[%s1255_s24 + $0xc0] sm:$0xff] %v379_v16 }
  0xde   : > { %395 = vst [vmem:[%s1255_s24 + $0x40] sm:$0xff] %v347_v17 }
  0xe0   : > { %v380_v18 = vpop.trf.xlu1 }
  0xe1   : > { %v348_v19 = vpop.trf.xlu0  ;;  %412 = vst [vmem:[%s1255_s24 + $0xc8] sm:$0xff] %v380_v18 }
  0xe2   : > { %396 = vst [vmem:[%s1255_s24 + $0x48] sm:$0xff] %v348_v19 }
  0xe4   : > { %v381_v20 = vpop.trf.xlu1 }
  0xe5   : > { %v349_v21 = vpop.trf.xlu0  ;;  %413 = vst [vmem:[%s1255_s24 + $0xd0] sm:$0xff] %v381_v20 }
  0xe6   : > { %397 = vst [vmem:[%s1255_s24 + $0x50] sm:$0xff] %v349_v21 }
  0xe8   : > { %v382_v22 = vpop.trf.xlu1 }
  0xe9   : > { %v350_v23 = vpop.trf.xlu0  ;;  %414 = vst [vmem:[%s1255_s24 + $0xd8] sm:$0xff] %v382_v22 }
  0xea   : > { %398 = vst [vmem:[%s1255_s24 + $0x58] sm:$0xff] %v350_v23 }
  0xec   : > { %v383_v24 = vpop.trf.xlu1 }
  0xed   : > { %v351_v25 = vpop.trf.xlu0  ;;  %415 = vst [vmem:[%s1255_s24 + $0xe0] sm:$0xff] %v383_v24 }
  0xee   : > { %399 = vst [vmem:[%s1255_s24 + $0x60] sm:$0xff] %v351_v25 }
  0xf0   : > { %v384_v26 = vpop.trf.xlu1 }
  0xf1   : > { %v352_v27 = vpop.trf.xlu0  ;;  %416 = vst [vmem:[%s1255_s24 + $0xe8] sm:$0xff] %v384_v26 }
  0xf2   : > { %400 = vst [vmem:[%s1255_s24 + $0x68] sm:$0xff] %v352_v27 }
  0xf4   : > { %v385_v28 = vpop.trf.xlu1 }
  0xf5   : > { %v353_v29 = vpop.trf.xlu0  ;;  %417 = vst [vmem:[%s1255_s24 + $0xf0] sm:$0xff] %v385_v28 }
  0xf6   : > { %401 = vst [vmem:[%s1255_s24 + $0x70] sm:$0xff] %v353_v29 }
  0xf8   : > { %v386_v30 = vpop.trf.xlu1 }
  0xf9   : > { %v354_v31 = vpop.trf.xlu0  ;;  %418 = vst [vmem:[%s1255_s24 + $0xf8] sm:$0xff] %v386_v30 }
  0xfa   : > { %402 = vst [vmem:[%s1255_s24 + $0x78] sm:$0xff] %v354_v31 }
  0xfb   : > { %925 = shalt.err (!%p922_p5)
}
  0xfc   : > { %s926_s30 = scalar_lea.hbm %s1294_s11, 4096  ;;  %s930_s9 = scalar_lea.hbm %s1419_s2, 16384 }
  0xfd   : > { %p927_p4 = scmp.ne.s32.totalorder %s1294_s11, %s926_s30  ;;  %p931_p7 = scmp.lt.s32.totalorder %s1294_s11, %s1419_s2 }
  0xfe   : > { %p932_p10 = scmp.lt.s32.totalorder %s930_s9, %s926_s30 }
  0xff   : > { %p928_p6 = pnand %p927_p4, %p1107_p9 }
 0x100   : > { %p933_p8 = por %p932_p10, %p931_p7 }
 0x101   : > { %p929_p0 = pneg %p928_p6 }
 0x103   : > { %p934_p13 = pnand %p933_p8, %p929_p0 }
 0x105   : > { %937 = shalt.err (!%p934_p13)
}
 0x106   : > { %s1033_s5 = smov 128   ;;  %s1034_s7 = smov 8   ;;  %v499_v32 = vpop.trf.xlu1  ;;  %v467_v33 = vpop.trf.xlu0 }
 0x107   : > { %784 = dma.vmem_to_hbm [thread:$0]  (%p1107_p9), %s1296_s4, 4096, %s1294_s11, %s548_s18, %s1033_s5, %s1033_s5, %s1034_s7  }
 0x108   : > { %s1327_s19 = scalar_lea.vmem [#allocation8], %s1172_s29  ;;  %s1365_s18 = scalar_lea.hbm %s1420_s3, %s777_s23 }
 0x109   : > { %531 = vst [vmem:[%s1327_s19 + $0x80] sm:$0xff] %v499_v32  ;;  %515 = vst [vmem:[%s1327_s19] sm:$0xff] %v467_v33  ;;  %s590_s29 = sshll.u32 %s1327_s19, 4  ;;  %s553_s21 = scalar_lea.sflag [#allocation9], %s1169_s28  ;;  %s1367_s29 = int_to_ptr.vmem [resolvable:$true] %s590_s29 }
 0x10a   : > { %v500_v34 = vpop.trf.xlu1  ;;  %v468_v35 = vpop.trf.xlu0  ;;  %s938_s6 = scalar_lea.vmem %s1367_s29, 4096  ;;  %s1035_s15 = smov [#allocation8]  }
 0x10b   : > { %532 = vst [vmem:[%s1327_s19 + $0x88] sm:$0xff] %v500_v34  ;;  %516 = vst [vmem:[%s1327_s19 + $0x8] sm:$0xff] %v468_v35  ;;  %p939_p1 = scmp.ne.s32.totalorder %s1367_s29, %s938_s6  ;;  %s942_s8 = sshll.u32 %s1035_s15, 4  ;;  %s943_s8 = int_to_ptr.vmem [resolvable:$false] %s942_s8 }
 0x10c   : > { %s944_s23 = scalar_lea.vmem %s943_s8, 8192  ;;  %p945_p3 = scmp.lt.s32.totalorder %s1367_s29, %s943_s8 }
 0x10d   : > { %p940_p12 = pnand %p939_p1, %p1107_p9  ;;  %p946_p5 = scmp.lt.s32.totalorder %s944_s23, %s938_s6 }
 0x10e   : > { %v501_v36 = vpop.trf.xlu1  ;;  %v469_v37 = vpop.trf.xlu0 }
 0x10f   : > { %533 = vst [vmem:[%s1327_s19 + $0x90] sm:$0xff] %v501_v36  ;;  %517 = vst [vmem:[%s1327_s19 + $0x10] sm:$0xff] %v469_v37  ;;  %p941_p2 = pneg %p940_p12  ;;  %p947_p4 = por %p946_p5, %p945_p3 }
 0x111   : > { %p948_p6 = pnand %p947_p4, %p941_p2 }
 0x112   : > { %v502_v38 = vpop.trf.xlu1  ;;  %v470_v39 = vpop.trf.xlu0 }
 0x113   : > { %534 = vst [vmem:[%s1327_s19 + $0x98] sm:$0xff] %v502_v38  ;;  %518 = vst [vmem:[%s1327_s19 + $0x18] sm:$0xff] %v470_v39 }
 0x116   : > { %v503_v40 = vpop.trf.xlu1  ;;  %v471_v41 = vpop.trf.xlu0 }
 0x117   : > { %535 = vst [vmem:[%s1327_s19 + $0xa0] sm:$0xff] %v503_v40  ;;  %519 = vst [vmem:[%s1327_s19 + $0x20] sm:$0xff] %v471_v41 }
 0x11a   : > { %v504_v42 = vpop.trf.xlu1  ;;  %v472_v43 = vpop.trf.xlu0 }
 0x11b   : > { %536 = vst [vmem:[%s1327_s19 + $0xa8] sm:$0xff] %v504_v42  ;;  %520 = vst [vmem:[%s1327_s19 + $0x28] sm:$0xff] %v472_v43 }
 0x11e   : > { %v505_v44 = vpop.trf.xlu1  ;;  %v473_v45 = vpop.trf.xlu0 }
 0x11f   : > { %537 = vst [vmem:[%s1327_s19 + $0xb0] sm:$0xff] %v505_v44  ;;  %521 = vst [vmem:[%s1327_s19 + $0x30] sm:$0xff] %v473_v45 }
 0x122   : > { %v506_v46 = vpop.trf.xlu1  ;;  %v474_v47 = vpop.trf.xlu0 }
 0x123   : > { %538 = vst [vmem:[%s1327_s19 + $0xb8] sm:$0xff] %v506_v46  ;;  %522 = vst [vmem:[%s1327_s19 + $0x38] sm:$0xff] %v474_v47 }
 0x126   : > { %v507_v48 = vpop.trf.xlu1  ;;  %v475_v49 = vpop.trf.xlu0 }
 0x127   : > { %539 = vst [vmem:[%s1327_s19 + $0xc0] sm:$0xff] %v507_v48  ;;  %523 = vst [vmem:[%s1327_s19 + $0x40] sm:$0xff] %v475_v49 }
 0x12a   : > { %v508_v50 = vpop.trf.xlu1  ;;  %v476_v51 = vpop.trf.xlu0 }
 0x12b   : > { %540 = vst [vmem:[%s1327_s19 + $0xc8] sm:$0xff] %v508_v50  ;;  %524 = vst [vmem:[%s1327_s19 + $0x48] sm:$0xff] %v476_v51 }
 0x12e   : > { %v509_v52 = vpop.trf.xlu1  ;;  %v477_v53 = vpop.trf.xlu0 }
 0x12f   : > { %541 = vst [vmem:[%s1327_s19 + $0xd0] sm:$0xff] %v509_v52  ;;  %525 = vst [vmem:[%s1327_s19 + $0x50] sm:$0xff] %v477_v53 }
 0x132   : > { %v510_v54 = vpop.trf.xlu1  ;;  %v478_v55 = vpop.trf.xlu0 }
 0x133   : > { %542 = vst [vmem:[%s1327_s19 + $0xd8] sm:$0xff] %v510_v54  ;;  %526 = vst [vmem:[%s1327_s19 + $0x58] sm:$0xff] %v478_v55 }
 0x136   : > { %v511_v56 = vpop.trf.xlu1  ;;  %v479_v57 = vpop.trf.xlu0 }
 0x137   : > { %543 = vst [vmem:[%s1327_s19 + $0xe0] sm:$0xff] %v511_v56  ;;  %527 = vst [vmem:[%s1327_s19 + $0x60] sm:$0xff] %v479_v57 }
 0x13a   : > { %v512_v58 = vpop.trf.xlu1  ;;  %v480_v59 = vpop.trf.xlu0 }
 0x13b   : > { %544 = vst [vmem:[%s1327_s19 + $0xe8] sm:$0xff] %v512_v58  ;;  %528 = vst [vmem:[%s1327_s19 + $0x68] sm:$0xff] %v480_v59 }
 0x13e   : > { %v513_v60 = vpop.trf.xlu1  ;;  %v481_v61 = vpop.trf.xlu0 }
 0x13f   : > { %545 = vst [vmem:[%s1327_s19 + $0xf0] sm:$0xff] %v513_v60  ;;  %529 = vst [vmem:[%s1327_s19 + $0x70] sm:$0xff] %v481_v61 }
 0x142   : > { %v514_v62 = vpop.trf.xlu1  ;;  %v482_v63 = vpop.trf.xlu0 }
 0x143   : > { %546 = vst [vmem:[%s1327_s19 + $0xf8] sm:$0xff] %v514_v62  ;;  %530 = vst [vmem:[%s1327_s19 + $0x78] sm:$0xff] %v482_v63 }
 0x144   : > { %951 = shalt.err (!%p948_p6)
}
 0x145   : > { %s952_s30 = scalar_lea.hbm %s1365_s18, 4096  ;;  %s956_s0 = scalar_lea.hbm %s1420_s3, 16384 }
 0x146   : > { %p953_p0 = scmp.ne.s32.totalorder %s1365_s18, %s952_s30  ;;  %p957_p8 = scmp.lt.s32.totalorder %s1365_s18, %s1420_s3 }
 0x147   : > { %p958_p13 = scmp.lt.s32.totalorder %s956_s0, %s952_s30 }
 0x148   : > { %p954_p7 = pnand %p953_p0, %p1107_p9 }
 0x149   : > { %p959_p1 = por %p958_p13, %p957_p8 }
 0x14a   : > { %p955_p10 = pneg %p954_p7 }
 0x14c   : > { %p960_p12 = pnand %p959_p1, %p955_p10 }
 0x14e   : > { %963 = shalt.err (!%p960_p12)
}
 0x14f   : > { %785 = dma.vmem_to_hbm [thread:$0]  (%p1107_p9), %s1367_s29, 4096, %s1365_s18, %s553_s21, %s1033_s5, %s1033_s5, %s1034_s7  }
 0x150 PF: > { %p803_p2 = scmp.ge.s32.totalorder %s1026_s17, 2  ;;  %s605_s24 = sand.u32 1, %s1006_s12  }
 0x151   : > { %s606_s19 = scalar_lea.sflag [#allocation4], %s605_s24 }
 0x152   : > { %p796_p3 = pnand %p803_p2, %p1114_p11 }
 0x154   : > { %p797_p5 = pneg %p796_p3 }
 0x156   : > { %997 = dma.done.wait (%p797_p5), %s606_s19, 4096  }
 0x157   : > { %999 = vsyncadd (%p797_p5), %s606_s19, 4294963200  ;;  %s615_s4 = scalar_lea.sflag [#allocation9], %s605_s24 }
 0x158   : > { %1001 = dma.done.wait (%p797_p5), %s615_s4, 4096  }
 0x159   : > { %1003 = vsyncadd (%p797_p5), %s615_s4, 4294963200  ;;  %s26_s17 = sadd.s32 1, %s1026_s17   ;;  %s1429_s12 = smov %s1010_s13 }
 0x15a   : > { %p23_p4 = scmp.ge.s32.totalorder %s26_s17, 6   ;;  %s1430_s13 = smov %s1014_s14 }
 0x15b   : > { %s1431_s14 = smov %s1112_s26  ;;  %s1432_s15 = smov %s1022_s16 }
 0x15c   : > { %s1433_s16 = smov %s1435_s20  ;;  %25 = sbr.rel (!%p23_p4) target bundleno = 12 (0xc), region = 103 }
 0x161   :  { %620 = vsyncpa [#allocation3], 1 }
 0x162   :  { %622 = vsyncpa [#allocation3 + $0x1], 1 }
 0x163   :  { %623 = vsyncpa [#allocation6], 1 }
 0x164   :  { %625 = vsyncpa [#allocation6 + $0x1], 1 }
 0x165   :  { %626 = vsyncpa [#allocation4], 1 }
 0x166   :  { %628 = vsyncpa [#allocation4 + $0x1], 1 }
 0x167   :  { %629 = vsyncpa [#allocation9], 1 }
 0x168   :  { %631 = vsyncpa [#allocation9 + $0x1], 1 }

</bundles_post_ra>
